<compile_context>
chip_gen: v6e
topology: v6e:2x2x1
jax: 0.10.0
libtpu: 0.0.40
codegen_flags: <defaults>
</compile_context>

<pallas_src>
import functools

import jax
import jax.numpy as jnp
from jax.experimental import pallas as pl
from jax.experimental.pallas import tpu as pltpu

NEG_SLOPE = 0.01  # PyTorch nn.LeakyReLU() default
LANE = 128
SUBLANE = 8


def _round_up(n, m):
    return ((n + m - 1) // m) * m


def _dencoder_kernel(x_ref, w1_ref, b1_ref, w2_ref, b2_ref, out_ref):
    # x_ref:  (TB, in_p)     f32
    # w1_ref: (in_p, out_p)  bf16, b1_ref: (1, out_p) f32
    # w2_ref: (out_p, out_p) bf16, b2_ref: (1, out_p) f32
    # out_ref:(TB, out_p)    f32
    x = x_ref[...].astype(jnp.bfloat16)

    # Linear 1 (bf16 operands, f32 accumulate) + LeakyReLU
    h = jnp.dot(x, w1_ref[...], preferred_element_type=jnp.float32) + b1_ref[...]
    h = jnp.maximum(h, NEG_SLOPE * h)

    # Linear 2 + LeakyReLU
    y = jnp.dot(h.astype(jnp.bfloat16), w2_ref[...],
                preferred_element_type=jnp.float32) + b2_ref[...]
    y = jnp.maximum(y, NEG_SLOPE * y)

    out_ref[...] = y.astype(out_ref.dtype)


def prepare_params(params, indim, outdim):
    """Pad feature dims to multiples of 128, transpose to (in, out), cast weights to bf16.

    `params` are in PyTorch nn.Linear layout: w (out_features, in_features), b (out_features,).
    Zero padding is exact: padded weight rows/cols are 0, padded bias entries are 0,
    and LeakyReLU(0) == 0, so padded output columns are 0 and are sliced off.
    """
    w1, b1, w2, b2 = params
    in_p = _round_up(indim, LANE)
    out_p = _round_up(outdim, LANE)

    w1_p = jnp.zeros((in_p, out_p), jnp.bfloat16)
    w1_p = w1_p.at[:indim, :outdim].set(jnp.transpose(w1).astype(jnp.bfloat16))
    b1_p = jnp.zeros((1, out_p), jnp.float32).at[0, :outdim].set(b1.astype(jnp.float32))

    w2_p = jnp.zeros((out_p, out_p), jnp.bfloat16)
    w2_p = w2_p.at[:outdim, :outdim].set(jnp.transpose(w2).astype(jnp.bfloat16))
    b2_p = jnp.zeros((1, out_p), jnp.float32).at[0, :outdim].set(b2.astype(jnp.float32))

    return w1_p, b1_p, w2_p, b2_p


@functools.partial(jax.jit, static_argnames=("indim", "outdim", "block_b"))
def dencoder_forward(x, prepared, *, indim, outdim, block_b=256):
    """x: (B, indim) f32. Returns (B, outdim) f32."""
    w1_p, b1_p, w2_p, b2_p = prepared
    in_p, out_p = w1_p.shape
    B = x.shape[0]

    # Batch tile: multiple of 8 sublanes, capped at block_b; single tile for small B.
    b_min = _round_up(B, SUBLANE)
    tb = min(_round_up(block_b, SUBLANE), b_min)
    b_p = _round_up(b_min, tb)
    grid = (b_p // tb,)

    # Zero-pad activations into the (batch, feature)-aligned slab (no-op when aligned).
    x = x.astype(jnp.float32)
    pad_b, pad_f = b_p - B, in_p - indim
    if pad_b or pad_f:
        x = jnp.pad(x, ((0, pad_b), (0, pad_f)))

    # VMEM budget: double-buffered activation blocks + weights/biases (counted
    # double-buffered for safety), x2 margin, capped under v7x's 64 MiB VMEM.
    est = (2 * tb * in_p * 4            # x block, double-buffered, f32
           + 2 * tb * out_p * 4         # out block, double-buffered, f32
           + 2 * (in_p * out_p * 2)     # w1 (bf16)
           + 2 * (out_p * out_p * 2)    # w2 (bf16)
           + 4 * out_p * 4)             # biases
    vmem_limit = min(2 * est + (1 << 20), 64 << 20)

    cost = pl.CostEstimate(
        flops=2 * b_p * (in_p * out_p + out_p * out_p),
        transcendentals=0,
        bytes_accessed=(b_p * in_p * 4 + b_p * out_p * 4
                        + in_p * out_p * 2 + out_p * out_p * 2 + 2 * out_p * 4),
    )

    out_arr = pl.pallas_call(
        _dencoder_kernel,
        out_shape=jax.ShapeDtypeStruct((b_p, out_p), jnp.float32),
        grid_spec=pltpu.PrefetchScalarGridSpec(
            num_scalar_prefetch=0,
            grid=grid,
            in_specs=[
                pl.BlockSpec((tb, in_p), lambda i: (i, 0)),      # x tile per grid step
                pl.BlockSpec((in_p, out_p), lambda i: (0, 0)),   # w1 resident
                pl.BlockSpec((1, out_p), lambda i: (0, 0)),      # b1 resident
                pl.BlockSpec((out_p, out_p), lambda i: (0, 0)),  # w2 resident
                pl.BlockSpec((1, out_p), lambda i: (0, 0)),      # b2 resident
            ],
            out_specs=pl.BlockSpec((tb, out_p), lambda i: (i, 0)),
        ),
        compiler_params=pltpu.CompilerParams(
            dimension_semantics=("parallel",),
            vmem_limit_bytes=int(vmem_limit),
        ),
        cost_estimate=cost,
    )(x, w1_p, b1_p, w2_p, b2_p)

    return out_arr[:B, :outdim]


def init_params(key, indim, outdim):
    """PyTorch-default-style Linear init, PyTorch layout: w (out, in), b (out,)."""
    k1, k2, k3, k4 = jax.random.split(key, 4)
    bound1 = 1.0 / float(indim) ** 0.5
    bound2 = 1.0 / float(outdim) ** 0.5
    w1 = jax.random.uniform(k1, (outdim, indim), jnp.float32, -bound1, bound1)
    b1 = jax.random.uniform(k2, (outdim,), jnp.float32, -bound1, bound1)
    w2 = jax.random.uniform(k3, (outdim, outdim), jnp.float32, -bound2, bound2)
    b2 = jax.random.uniform(k4, (outdim,), jnp.float32, -bound2, bound2)
    return w1, b1, w2, b2


if __name__ == "__main__":
    # Small shapes consistent with DEncoder.forward: x (batch, indim) -> (batch, outdim)
    batch, indim, outdim = 4, 16, 32

    key = jax.random.PRNGKey(0)
    kx, kp = jax.random.split(key)
    x = jax.random.normal(kx, (batch, indim), jnp.float32)
    params = init_params(kp, indim, outdim)
    prepared = prepare_params(params, indim, outdim)

    out = dencoder_forward(x, prepared, indim=indim, outdim=outdim)
    out = jax.block_until_ready(out)

    # Pure-JAX f32 reference (kernel matmul operands are bf16, so use a
    # tolerance that covers bf16 rounding of the accumulated products).
    w1, b1, w2, b2 = params
    h = x @ w1.T + b1
    h = jnp.where(h >= 0, h, NEG_SLOPE * h)
    ref = h @ w2.T + b2
    ref = jnp.where(ref >= 0, ref, NEG_SLOPE * ref)

    assert out.shape == (batch, outdim), f"bad shape {out.shape}"
    assert jnp.allclose(out, ref, atol=3e-2, rtol=3e-2), "mismatch vs reference"

    print("KERNEL_OK")
</pallas_src>

<mosaic_0001>
module attributes {stable_mosaic.version = 11 : i64} {
  func.func @_dencoder_kernel(%arg0: i32, %arg1: memref<8x128xf32, #tpu.memory_space<vmem>>, %arg2: memref<128x128xbf16, #tpu.memory_space<vmem>>, %arg3: memref<1x128xf32, #tpu.memory_space<vmem>>, %arg4: memref<128x128xbf16, #tpu.memory_space<vmem>>, %arg5: memref<1x128xf32, #tpu.memory_space<vmem>>, %arg6: memref<8x128xf32, #tpu.memory_space<vmem>>) attributes {dimension_semantics = [#tpu.dimension_semantics<parallel>], iteration_bounds = array<i64: 1>, scalar_prefetch = 0 : i64, scratch_operands = 0 : i64, tpu.core_type = #tpu.core_type<tc>, window_params = [{transform_indices = @transform_0, window_bounds = array<i64: 8, 128>}, {pipeline_mode = #tpu.pipeline_mode<synchronous>, transform_indices = @transform_1, window_bounds = array<i64: 128, 128>}, {pipeline_mode = #tpu.pipeline_mode<synchronous>, transform_indices = @transform_2, window_bounds = array<i64: 1, 128>}, {pipeline_mode = #tpu.pipeline_mode<synchronous>, transform_indices = @transform_3, window_bounds = array<i64: 128, 128>}, {pipeline_mode = #tpu.pipeline_mode<synchronous>, transform_indices = @transform_4, window_bounds = array<i64: 1, 128>}, {transform_indices = @transform_5, window_bounds = array<i64: 8, 128>}]} {
    %c0 = arith.constant 0 : index
    %c0_0 = arith.constant 0 : index
    %0 = vector.load %arg1[%c0, %c0_0] : memref<8x128xf32, #tpu.memory_space<vmem>>, vector<8x128xf32>
    %1 = arith.truncf %0 : vector<8x128xf32> to vector<8x128xbf16>
    %c0_1 = arith.constant 0 : index
    %c0_2 = arith.constant 0 : index
    %2 = vector.load %arg2[%c0_1, %c0_2] : memref<128x128xbf16, #tpu.memory_space<vmem>>, vector<128x128xbf16>
    %cst = arith.constant dense<0.000000e+00> : vector<8x128xf32>
    %3 = tpu.matmul %1, %2, %cst {dimension_numbers = #tpu.dot_dimension_numbers<[1], [0], [0], [1], [0, 0, 1, 1], [], []>} : vector<8x128xbf16>, vector<128x128xbf16>, vector<8x128xf32> -> vector<8x128xf32>
    %c0_3 = arith.constant 0 : index
    %c0_4 = arith.constant 0 : index
    %4 = vector.load %arg3[%c0_3, %c0_4] : memref<1x128xf32, #tpu.memory_space<vmem>>, vector<1x128xf32>
    %5 = vector.broadcast %4 : vector<1x128xf32> to vector<8x128xf32>
    %6 = arith.addf %3, %5 : vector<8x128xf32>
    %cst_5 = arith.constant 0.00999999977 : f32
    %7 = vector.broadcast %cst_5 : f32 to vector<8x128xf32>
    %8 = arith.mulf %7, %6 : vector<8x128xf32>
    %9 = arith.maximumf %6, %8 : vector<8x128xf32>
    %10 = arith.truncf %9 : vector<8x128xf32> to vector<8x128xbf16>
    %c0_6 = arith.constant 0 : index
    %c0_7 = arith.constant 0 : index
    %11 = vector.load %arg4[%c0_6, %c0_7] : memref<128x128xbf16, #tpu.memory_space<vmem>>, vector<128x128xbf16>
    %cst_8 = arith.constant dense<0.000000e+00> : vector<8x128xf32>
    %12 = tpu.matmul %10, %11, %cst_8 {dimension_numbers = #tpu.dot_dimension_numbers<[1], [0], [0], [1], [0, 0, 1, 1], [], []>} : vector<8x128xbf16>, vector<128x128xbf16>, vector<8x128xf32> -> vector<8x128xf32>
    %c0_9 = arith.constant 0 : index
    %c0_10 = arith.constant 0 : index
    %13 = vector.load %arg5[%c0_9, %c0_10] : memref<1x128xf32, #tpu.memory_space<vmem>>, vector<1x128xf32>
    %14 = vector.broadcast %13 : vector<1x128xf32> to vector<8x128xf32>
    %15 = arith.addf %12, %14 : vector<8x128xf32>
    %cst_11 = arith.constant 0.00999999977 : f32
    %16 = vector.broadcast %cst_11 : f32 to vector<8x128xf32>
    %17 = arith.mulf %16, %15 : vector<8x128xf32>
    %18 = arith.maximumf %15, %17 : vector<8x128xf32>
    %c0_12 = arith.constant 0 : index
    %c0_13 = arith.constant 0 : index
    %19 = vector.load %arg6[%c0_12, %c0_13] : memref<8x128xf32, #tpu.memory_space<vmem>>, vector<8x128xf32>
    tpu.vector_store %arg6[%c0_12, %c0_13], %18 {strides = array<i32>} : memref<8x128xf32, #tpu.memory_space<vmem>>, vector<8x128xf32>,
    return
  }
  func.func @transform_0(%arg0: i32) -> (i32, i32) {
    %c0_i32 = arith.constant 0 : i32
    %c0_i32_0 = arith.constant 0 : i32
    return %arg0, %c0_i32 : i32, i32
  }
  func.func @transform_1(%arg0: i32) -> (i32, i32) {
    %c0_i32 = arith.constant 0 : i32
    %c0_i32_0 = arith.constant 0 : i32
    %c0_i32_1 = arith.constant 0 : i32
    return %c0_i32, %c0_i32_0 : i32, i32
  }
  func.func @transform_2(%arg0: i32) -> (i32, i32) {
    %c0_i32 = arith.constant 0 : i32
    %c0_i32_0 = arith.constant 0 : i32
    %c0_i32_1 = arith.constant 0 : i32
    return %c0_i32, %c0_i32_0 : i32, i32
  }
  func.func @transform_3(%arg0: i32) -> (i32, i32) {
    %c0_i32 = arith.constant 0 : i32
    %c0_i32_0 = arith.constant 0 : i32
    %c0_i32_1 = arith.constant 0 : i32
    return %c0_i32, %c0_i32_0 : i32, i32
  }
  func.func @transform_4(%arg0: i32) -> (i32, i32) {
    %c0_i32 = arith.constant 0 : i32
    %c0_i32_0 = arith.constant 0 : i32
    %c0_i32_1 = arith.constant 0 : i32
    return %c0_i32, %c0_i32_0 : i32, i32
  }
  func.func @transform_5(%arg0: i32) -> (i32, i32) {
    %c0_i32 = arith.constant 0 : i32
    %c0_i32_0 = arith.constant 0 : i32
    return %arg0, %c0_i32 : i32, i32
  }
}

</mosaic_0001>

<bundles_post_ra>
// kernel: dencoder_forward.1
= control target key start
LH: loop header
LB: loop body
LE: loop exit
PB: predicated region body
PF: predicated region fallthrough
CT: control target
= control target key end

     0   :  { %10 = vsyncpa [#allocation3], 0  ;;  %s481_s0 = inlined_call_operand.vmem [shape: f32[8,128], index: 0, kind: input, shape index: {}]   ;;  %s482_s1 = inlined_call_operand.hbm [shape: bf16[128,128], index: 1, kind: input, shape index: {}]   ;;  %s483_s2 = inlined_call_operand.vmem [shape: f32[1,128], index: 2, kind: input, shape index: {}]   ;;  %s484_s3 = inlined_call_operand.hbm [shape: bf16[128,128], index: 3, kind: input, shape index: {}]   ;;  %s485_s4 = inlined_call_operand.vmem [shape: f32[1,128], index: 4, kind: input, shape index: {}]   ;;  %s486_s5 = inlined_call_operand.vmem [shape: f32[8,128], index: 5, kind: output, shape index: {}]  }
   0x1   :  { %11 = vsyncpa [#allocation5], 0  ;;  %s427_s18 = smov [#allocation2]  }
   0x2   :  { %s19_s19 = sshll.u32 %s427_s18, 4  ;;  %s20_s19 = int_to_ptr.vmem [resolvable:$true] %s19_s19 }
   0x3   :  { %s391_s20 = scalar_lea.vmem %s20_s19, 1024  ;;  %p396_p1 = scmp.lt.s32.totalorder %s20_s19, %s20_s19 }
   0x4   :  { %p392_p0 = scmp.ne.s32.totalorder %s20_s19, %s391_s20  ;;  %p397_p2 = scmp.lt.s32.totalorder %s391_s20, %s391_s20 }
   0x6   :  { %p398_p3 = por %p397_p2, %p396_p1 }
   0x8   :  { %p399_p4 = pnand %p398_p3, %p392_p0 }
   0xa   :  { %402 = shalt.err (!%p399_p4)
}
   0xb   :  { %s428_s21 = smov 64   ;;  %s429_s22 = smov 4  }
   0xc   :  { %25 = dma.hbm_to_vmem [thread:$0]  %s482_s1, 1024, %s20_s19, [#allocation3], %s428_s21, %s428_s21, %s429_s22  }
   0xd   :  { %s430_s25 = smov [#allocation4]  }
   0xe   :  { %s33_s26 = sshll.u32 %s430_s25, 4  ;;  %s34_s26 = int_to_ptr.vmem [resolvable:$true] %s33_s26 }
   0xf   :  { %s411_s27 = scalar_lea.vmem %s34_s26, 1024  ;;  %p416_p6 = scmp.lt.s32.totalorder %s34_s26, %s34_s26 }
  0x10   :  { %p412_p5 = scmp.ne.s32.totalorder %s34_s26, %s411_s27  ;;  %p417_p7 = scmp.lt.s32.totalorder %s411_s27, %s411_s27 }
  0x12   :  { %p418_p8 = por %p417_p7, %p416_p6 }
  0x14   :  { %p419_p9 = pnand %p418_p8, %p412_p5 }
  0x16   :  { %422 = shalt.err (!%p419_p9)
}
  0x17   :  { %39 = dma.hbm_to_vmem [thread:$0]  %s484_s3, 1024, %s34_s26, [#allocation5], %s428_s21, %s428_s21, %s429_s22  }
  0x18   :  { %423 = dma.done.wait [#allocation3], 1024  }
  0x19   :  { %424 = vsyncadd [#allocation3], 4294966272 }
  0x1a   :  { %425 = dma.done.wait [#allocation5], 1024  }
  0x1b   :  { %426 = vsyncadd [#allocation5], 4294966272  ;;  %v431_v0 = vmov 0.0   ;;  %vm432_vm0 = vmmov 0   ;;  %v367_v1 = vld [vmem:[#allocation2 + $0x38] sm:$0xff]   ;;  %v368_v2 = vld [vmem:[#allocation2 + $0x30] sm:$0xff]  }
  0x1c   :  { %321 = vmatprep.subr.bf16.mxu0 %v431_v0  ;;  %337 = vmatprep.mubr.msk.bf16.mxu0 %vm432_vm0, %v431_v0  ;;  %v369_v3 = vld [vmem:[#allocation2 + $0x28] sm:$0xff]   ;;  %v375_v4 = vld [vmem:[#allocation4 + $0x38] sm:$0xff]   ;;  %v370_v5 = vld [vmem:[#allocation2 + $0x20] sm:$0xff]  }
  0x1d   :  { %341 = vmatprep.subr.bf16.mxu1 %v431_v0  ;;  %357 = vmatprep.mubr.msk.bf16.mxu1 %vm432_vm0, %v431_v0  ;;  %v376_v6 = vld [vmem:[#allocation4 + $0x30] sm:$0xff]   ;;  %v371_v7 = vld [vmem:[#allocation2 + $0x18] sm:$0xff]   ;;  %v377_v8 = vld [vmem:[#allocation4 + $0x28] sm:$0xff]  }
  0x1e   :  { %322 = vmatpush3.bf16.msra.mxu0 %v367_v1  ;;  %342 = vmatpush3.bf16.msra.mxu1 %v375_v4  ;;  %v372_v9 = vld [vmem:[#allocation2 + $0x10] sm:$0xff]   ;;  %v378_v10 = vld [vmem:[#allocation4 + $0x20] sm:$0xff]   ;;  %v373_v11 = vld [vmem:[#allocation2 + $0x8] sm:$0xff]  }
  0x1f   :  { %323 = vmatprep.subr.bf16.mxu0 %v431_v0  ;;  %343 = vmatprep.subr.bf16.mxu1 %v431_v0  ;;  %v379_v12 = vld [vmem:[#allocation4 + $0x18] sm:$0xff]   ;;  %v374_v13 = vld [vmem:[#allocation2] sm:$0xff]   ;;  %v380_v15 = vld [vmem:[#allocation4 + $0x10] sm:$0xff]  }
  0x20   :  { %v49_v14 = vld [vmem:[%s481_s0] sm:$0xff]  ;;  %v381_v17 = vld [vmem:[#allocation4 + $0x8] sm:$0xff]  }
  0x21   :  { %v50_v16 = vpack.c.bf16 %v49_v14, %v49_v14  ;;  %v382_v18 = vld [vmem:[#allocation4] sm:$0xff]  }
  0x22   :  { %324 = vmatpush3.bf16.msra.mxu0 %v368_v2  ;;  %344 = vmatpush3.bf16.msra.mxu1 %v376_v6  ;;  %v285_v19 = vld [vmem:[%s483_s2] ss:$0 sm:$0xff] }
  0x23   :  { %325 = vmatprep.subr.bf16.mxu0 %v431_v0  ;;  %345 = vmatprep.subr.bf16.mxu1 %v431_v0  ;;  %v294_v28 = vld [vmem:[%s485_s4] ss:$0 sm:$0xff] }
  0x26   :  { %326 = vmatpush3.bf16.msra.mxu0 %v369_v3  ;;  %346 = vmatpush3.bf16.msra.mxu1 %v377_v8 }
  0x27   :  { %327 = vmatprep.subr.bf16.mxu0 %v431_v0  ;;  %347 = vmatprep.subr.bf16.mxu1 %v431_v0 }
  0x2a   :  { %328 = vmatpush3.bf16.msra.mxu0 %v370_v5  ;;  %348 = vmatpush3.bf16.msra.mxu1 %v378_v10 }
  0x2b   :  { %329 = vmatprep.subr.bf16.mxu0 %v431_v0  ;;  %349 = vmatprep.subr.bf16.mxu1 %v431_v0 }
  0x2e   :  { %330 = vmatpush3.bf16.msra.mxu0 %v371_v7  ;;  %350 = vmatpush3.bf16.msra.mxu1 %v379_v12 }
  0x2f   :  { %331 = vmatprep.subr.bf16.mxu0 %v431_v0  ;;  %351 = vmatprep.subr.bf16.mxu1 %v431_v0 }
  0x32   :  { %332 = vmatpush3.bf16.msra.mxu0 %v372_v9  ;;  %352 = vmatpush3.bf16.msra.mxu1 %v380_v15 }
  0x33   :  { %333 = vmatprep.subr.bf16.mxu0 %v431_v0  ;;  %353 = vmatprep.subr.bf16.mxu1 %v431_v0 }
  0x36   :  { %334 = vmatpush3.bf16.msra.mxu0 %v373_v11  ;;  %354 = vmatpush3.bf16.msra.mxu1 %v381_v17 }
  0x37   :  { %335 = vmatprep.subr.bf16.mxu0 %v431_v0  ;;  %355 = vmatprep.subr.bf16.mxu1 %v431_v0 }
  0x3a   :  { %336 = vmatpush3.bf16.msra.mxu0 %v374_v13  ;;  %356 = vmatpush3.bf16.msra.mxu1 %v382_v18 }
  0x3d   :  { %338 = vmatmul.mubr.bf16.vlgmr.msra.gmra.mxu0 %v50_v16 }
  0xfd   :  { %v156_v20 = vpop.f32.mrf.mxu0 }
  0xfe   :  { %v157_v21 = vadd.f32 %v285_v19, %v156_v20 }
  0xff   :  { %v339_v22 = vpop.f32.mrf.mxu0 }
 0x100   :  { %v162_v23 = vmul.f32 0.01, %v157_v21 }
 0x101   :  { %v159_v24 = vpop.f32.mrf.mxu0 }
 0x102   :  { %v163_v25 = vmax.f32 %v157_v21, %v162_v23 }
 0x103   :  { %v340_v26 = vpop.f32.mrf.mxu0 }
 0x104   :  { %v164_v27 = vpack.c.bf16 %v163_v25, %v163_v25 }
 0x106   :  { %358 = vmatmul.mubr.bf16.vlgmr.msra.gmra.mxu1 %v164_v27 }
 0x1c6   :  { %v270_v29 = vpop.f32.mrf.mxu1 }
 0x1c7   :  { %v271_v30 = vadd.f32 %v294_v28, %v270_v29 }
 0x1c8   :  { %v359_v31 = vpop.f32.mrf.mxu1 }
 0x1c9   :  { %v276_v32 = vmul.f32 0.01, %v271_v30 }
 0x1ca   :  { %v273_v33 = vpop.f32.mrf.mxu1 }
 0x1cb   :  { %v277_v34 = vmax.f32 %v271_v30, %v276_v32 }
 0x1cc   :  { %v360_v35 = vpop.f32.mrf.mxu1 }
 0x1cd   :  { %278 = vst [vmem:[%s486_s5] sm:$0xff] %v277_v34 }
 0x1ce   :  { %283 = vsyncpa [#allocation3], 1 }
 0x1cf   :  { %284 = vsyncpa [#allocation5], 1 }

</bundles_post_ra>
